<compile_context>
chip_gen: v5e
topology: v5e:2x2
jax: 0.10.0
libtpu: 0.0.40
codegen_flags: <defaults>
</compile_context>

<pallas_src>
import functools

import jax
import jax.numpy as jnp
from jax import lax
from jax.experimental import pallas as pl
from jax.experimental.pallas import tpu as pltpu


def actor_kernel(x_ref, w1_ref, b1_ref, w2_ref, b2_ref, w3_ref, b3_ref, out_ref):
    # x: (tb, obs) batch-major tile; weights keep PyTorch (out, in) layout;
    # biases are (out, 1) f32 columns.  All matmuls accumulate in f32.
    x = x_ref[...]
    cdt = x.dtype

    # Layer 1: contract the feature axis of both operands -> (h1, tb).
    # This keeps the batch on lanes without any wrapper-side transpose.
    h1 = lax.dot_general(
        w1_ref[...], x,
        dimension_numbers=(((1,), (1,)), ((), ())),
        preferred_element_type=jnp.float32,
    ) + b1_ref[...]
    h1 = jnp.maximum(h1, 0.0).astype(cdt)

    # Layer 2: Linear + ReLU -> (h2, tb)
    h2 = jnp.dot(w2_ref[...], h1, preferred_element_type=jnp.float32) + b2_ref[...]
    h2 = jnp.maximum(h2, 0.0).astype(cdt)

    # Layer 3: logits (A_pad, tb).  Padded action rows have a -1e30 bias so
    # they contribute ~0 to the softmax denominator.
    logits = jnp.dot(w3_ref[...], h2, preferred_element_type=jnp.float32) + b3_ref[...]

    # LogSoftmax over the action (sublane) axis; batch stays on lanes; f32.
    m = jnp.max(logits, axis=0, keepdims=True)
    z = logits - m
    lse = jnp.log(jnp.sum(jnp.exp(z), axis=0, keepdims=True))
    out_ref[...] = (z - lse).astype(out_ref.dtype)


def _round_up(x, m):
    return ((x + m - 1) // m) * m


def _pick_batch_tile(B, block_b):
    """Batch tile along the lane axis of the output / sublane axis of the input."""
    if B <= 256:
        # One full-extent block: zero batch padding (small rollout / action-selection).
        return B
    b128 = _round_up(B, 128)
    if b128 <= 2 * block_b:
        # Aim for (at least) 2 grid steps so a 2-TC chip (v7x) shards the batch,
        # tiles rounded to 256 lanes for the 256-wide MXU on v6e/v7x.
        return min(_round_up(b128 // 2, 256), block_b)
    # Very large batches: big tiles amortize per-grid-step overhead.
    return block_b


@functools.partial(jax.jit, static_argnames=("block_b", "compute_dtype"))
def actor_forward(state, params, block_b=2048, compute_dtype=jnp.bfloat16):
    """state: (B, observation_space).
    params: PyTorch nn.Linear layout (w: (out, in), b: (out,)) for 3 layers.
    Returns log_probs: (B, action_space) f32."""
    w1, b1, w2, b2, w3, b3 = params
    B, obs = state.shape
    A = w3.shape[0]
    A_pad = max(8, _round_up(A, 8))          # full 8-sublane output tile
    cd = jnp.dtype(compute_dtype)

    # bf16 activation/weight stream; biases stay f32 (added to f32 accumulators).
    x = state.astype(cd)
    w1c, w2c = w1.astype(cd), w2.astype(cd)
    w3p = jnp.zeros((A_pad, w3.shape[1]), cd).at[:A, :].set(w3.astype(cd))
    b3p = jnp.full((A_pad, 1), -1e30, jnp.float32).at[:A, 0].set(b3.astype(jnp.float32))
    b1c = b1.astype(jnp.float32).reshape(-1, 1)
    b2c = b2.astype(jnp.float32).reshape(-1, 1)

    tb = _pick_batch_tile(B, block_b)
    grid = (pl.cdiv(B, tb),)                 # ragged last block: OOB input reads are
                                             # garbage columns, OOB output writes dropped

    def whole(arr):
        # Whole array, same block every step -> stays resident in VMEM.
        return pl.BlockSpec(arr.shape, lambda i, _n=arr.ndim: (0,) * _n)

    h1_dim, h2_dim = w1.shape[0], w2.shape[0]
    weight_bytes = sum(int(a.size) * a.dtype.itemsize
                       for a in (w1c, b1c, w2c, b2c, w3p, b3p))
    cost = pl.CostEstimate(
        flops=2 * B * (obs * h1_dim + h1_dim * h2_dim + h2_dim * A_pad),
        transcendentals=B * (A_pad + 1),
        bytes_accessed=B * obs * cd.itemsize + B * A_pad * 4 + weight_bytes,
    )

    out_t = pl.pallas_call(
        actor_kernel,
        out_shape=jax.ShapeDtypeStruct((A_pad, B), jnp.float32),
        grid=grid,
        in_specs=[
            pl.BlockSpec((tb, obs), lambda i: (i, 0)),     # batch-major input tile
            whole(w1c), whole(b1c),
            whole(w2c), whole(b2c),
            whole(w3p), whole(b3p),
        ],
        out_specs=pl.BlockSpec((A_pad, tb), lambda i: (0, i)),  # lane-dense store
        compiler_params=pltpu.CompilerParams(
            dimension_semantics=("parallel",),             # megacore sharding (v7x)
        ),
        cost_estimate=cost,
    )(x, w1c, b1c, w2c, b2c, w3p, b3p)

    # Only wrapper-side reshuffle left: tiny (A, B) -> (B, A) output transpose.
    return out_t[:A, :].T


def init_params(key, observation_space, action_space, hiddens=(64, 32)):
    """PyTorch nn.Linear default init (U[-1/sqrt(fan_in), 1/sqrt(fan_in)]),
    stored in PyTorch layout: w (out, in), b (out,)."""
    dims = [observation_space, *hiddens, action_space]
    params = []
    for i in range(len(dims) - 1):
        fan_in, fan_out = dims[i], dims[i + 1]
        key, kw, kb = jax.random.split(key, 3)
        bound = 1.0 / jnp.sqrt(jnp.float32(fan_in))
        w = jax.random.uniform(kw, (fan_out, fan_in), jnp.float32, -bound, bound)
        b = jax.random.uniform(kb, (fan_out,), jnp.float32, -bound, bound)
        params.extend([w, b])
    return tuple(params)


def _reference(state, params, compute_dtype=jnp.float32):
    """Pure-JAX reference mirroring the kernel's mixed precision."""
    cd = jnp.dtype(compute_dtype)
    w1, b1, w2, b2, w3, b3 = params

    def dense(x, w, b):
        y = jnp.dot(x.astype(cd), w.T.astype(cd), preferred_element_type=jnp.float32)
        return y + b.astype(jnp.float32)

    h1 = jnp.maximum(dense(state, w1, b1), 0.0)
    h2 = jnp.maximum(dense(h1, w2, b2), 0.0)
    logits = dense(h2, w3, b3)
    return jax.nn.log_softmax(logits, axis=-1)


if __name__ == "__main__":
    # Small shapes consistent with the module's forward.
    batch = 2
    observation_space = 16   # flattened state size
    action_space = 4
    hiddens = (64, 32)

    key = jax.random.PRNGKey(0)
    key, kx = jax.random.split(key)
    state = jax.random.normal(kx, (batch, observation_space), jnp.float32)
    params = init_params(key, observation_space, action_space, hiddens)

    log_probs = jax.block_until_ready(actor_forward(state, params))
    assert log_probs.shape == (batch, action_space)
    # Tight check against a precision-matched (bf16 stream, f32 accum) reference.
    assert jnp.allclose(log_probs, _reference(state, params, jnp.bfloat16),
                        atol=1e-2, rtol=1e-2)
    # Loose check against the full-f32 reference (bf16 rounding tolerance).
    assert jnp.allclose(log_probs, _reference(state, params, jnp.float32),
                        atol=5e-2, rtol=5e-2)
    # log-softmax rows should exponentiate-sum to ~1
    assert jnp.allclose(jnp.sum(jnp.exp(log_probs), axis=-1), 1.0, atol=1e-3)

    # Exercise multi-tile grids: ragged (300 -> two 256-wide tiles, masked last
    # block) and even (1024 -> two 512-wide tiles, feeds both v7x TCs).
    for big_b in (300, 1024):
        key, kx = jax.random.split(key)
        s = jax.random.normal(kx, (big_b, observation_space), jnp.float32)
        lp = jax.block_until_ready(actor_forward(s, params))
        assert lp.shape == (big_b, action_space)
        assert jnp.allclose(lp, _reference(s, params, jnp.bfloat16),
                            atol=1e-2, rtol=1e-2)
        assert jnp.allclose(jnp.sum(jnp.exp(lp), axis=-1), 1.0, atol=1e-3)

    print("KERNEL_OK")
</pallas_src>

<mosaic_0001>
module attributes {stable_mosaic.version = 11 : i64} {
  func.func @actor_kernel(%arg0: i32, %arg1: memref<2x16xbf16, #tpu.memory_space<vmem>>, %arg2: memref<64x16xbf16, #tpu.memory_space<vmem>>, %arg3: memref<64x1xf32, #tpu.memory_space<vmem>>, %arg4: memref<32x64xbf16, #tpu.memory_space<vmem>>, %arg5: memref<32x1xf32, #tpu.memory_space<vmem>>, %arg6: memref<8x32xbf16, #tpu.memory_space<vmem>>, %arg7: memref<8x1xf32, #tpu.memory_space<vmem>>, %arg8: memref<8x2xf32, #tpu.memory_space<vmem>>) attributes {dimension_semantics = [#tpu.dimension_semantics<parallel>], iteration_bounds = array<i64: 1>, scalar_prefetch = 0 : i64, scratch_operands = 0 : i64, tpu.core_type = #tpu.core_type<tc>, window_params = [{transform_indices = @transform_0, window_bounds = array<i64: 2, 16>}, {pipeline_mode = #tpu.pipeline_mode<synchronous>, transform_indices = @transform_1, window_bounds = array<i64: 64, 16>}, {pipeline_mode = #tpu.pipeline_mode<synchronous>, transform_indices = @transform_2, window_bounds = array<i64: 64, 1>}, {pipeline_mode = #tpu.pipeline_mode<synchronous>, transform_indices = @transform_3, window_bounds = array<i64: 32, 64>}, {pipeline_mode = #tpu.pipeline_mode<synchronous>, transform_indices = @transform_4, window_bounds = array<i64: 32, 1>}, {pipeline_mode = #tpu.pipeline_mode<synchronous>, transform_indices = @transform_5, window_bounds = array<i64: 8, 32>}, {pipeline_mode = #tpu.pipeline_mode<synchronous>, transform_indices = @transform_6, window_bounds = array<i64: 8, 1>}, {transform_indices = @transform_7, window_bounds = array<i64: 8, 2>}]} {
    %c0 = arith.constant 0 : index
    %c0_0 = arith.constant 0 : index
    %0 = vector.load %arg1[%c0, %c0_0] : memref<2x16xbf16, #tpu.memory_space<vmem>>, vector<2x16xbf16>
    %c0_1 = arith.constant 0 : index
    %c0_2 = arith.constant 0 : index
    %1 = vector.load %arg2[%c0_1, %c0_2] : memref<64x16xbf16, #tpu.memory_space<vmem>>, vector<64x16xbf16>
    %cst = arith.constant dense<0.000000e+00> : vector<64x2xf32>
    %2 = tpu.matmul %1, %0, %cst {dimension_numbers = #tpu.dot_dimension_numbers<[1], [1], [0], [0], [0, 0, 1, 0], [], []>} : vector<64x16xbf16>, vector<2x16xbf16>, vector<64x2xf32> -> vector<64x2xf32>
    %c0_3 = arith.constant 0 : index
    %c0_4 = arith.constant 0 : index
    %3 = vector.load %arg3[%c0_3, %c0_4] : memref<64x1xf32, #tpu.memory_space<vmem>>, vector<64x1xf32>
    %4 = vector.broadcast %3 : vector<64x1xf32> to vector<64x2xf32>
    %5 = arith.addf %2, %4 : vector<64x2xf32>
    %cst_5 = arith.constant 0.000000e+00 : f32
    %6 = vector.broadcast %cst_5 : f32 to vector<64x2xf32>
    %7 = arith.maximumf %5, %6 : vector<64x2xf32>
    %8 = arith.truncf %7 : vector<64x2xf32> to vector<64x2xbf16>
    %c0_6 = arith.constant 0 : index
    %c0_7 = arith.constant 0 : index
    %9 = vector.load %arg4[%c0_6, %c0_7] : memref<32x64xbf16, #tpu.memory_space<vmem>>, vector<32x64xbf16>
    %cst_8 = arith.constant dense<0.000000e+00> : vector<32x2xf32>
    %10 = tpu.matmul %9, %8, %cst_8 {dimension_numbers = #tpu.dot_dimension_numbers<[1], [0], [0], [1], [0, 0, 1, 1], [], []>} : vector<32x64xbf16>, vector<64x2xbf16>, vector<32x2xf32> -> vector<32x2xf32>
    %c0_9 = arith.constant 0 : index
    %c0_10 = arith.constant 0 : index
    %11 = vector.load %arg5[%c0_9, %c0_10] : memref<32x1xf32, #tpu.memory_space<vmem>>, vector<32x1xf32>
    %12 = vector.broadcast %11 : vector<32x1xf32> to vector<32x2xf32>
    %13 = arith.addf %10, %12 : vector<32x2xf32>
    %cst_11 = arith.constant 0.000000e+00 : f32
    %14 = vector.broadcast %cst_11 : f32 to vector<32x2xf32>
    %15 = arith.maximumf %13, %14 : vector<32x2xf32>
    %16 = arith.truncf %15 : vector<32x2xf32> to vector<32x2xbf16>
    %c0_12 = arith.constant 0 : index
    %c0_13 = arith.constant 0 : index
    %17 = vector.load %arg6[%c0_12, %c0_13] : memref<8x32xbf16, #tpu.memory_space<vmem>>, vector<8x32xbf16>
    %cst_14 = arith.constant dense<0.000000e+00> : vector<8x2xf32>
    %18 = tpu.matmul %17, %16, %cst_14 {dimension_numbers = #tpu.dot_dimension_numbers<[1], [0], [0], [1], [0, 0, 1, 1], [], []>} : vector<8x32xbf16>, vector<32x2xbf16>, vector<8x2xf32> -> vector<8x2xf32>
    %c0_15 = arith.constant 0 : index
    %c0_16 = arith.constant 0 : index
    %19 = vector.load %arg7[%c0_15, %c0_16] : memref<8x1xf32, #tpu.memory_space<vmem>>, vector<8x1xf32>
    %20 = vector.broadcast %19 : vector<8x1xf32> to vector<8x2xf32>
    %21 = arith.addf %18, %20 : vector<8x2xf32>
    %cst_17 = arith.constant dense<0xFF800000> : vector<2xf32>
    %22 = vector.multi_reduction <maximumf>, %21, %cst_17 [0] : vector<8x2xf32> to vector<2xf32>
    %23 = vector.shape_cast %22 : vector<2xf32> to vector<1x2xf32>
    %24 = vector.broadcast %23 : vector<1x2xf32> to vector<8x2xf32>
    %25 = arith.subf %21, %24 : vector<8x2xf32>
    %26 = math.exp %25 : vector<8x2xf32>
    %cst_18 = arith.constant dense<0.000000e+00> : vector<2xf32>
    %27 = vector.multi_reduction <add>, %26, %cst_18 [0] : vector<8x2xf32> to vector<2xf32>
    %28 = vector.shape_cast %27 : vector<2xf32> to vector<1x2xf32>
    %29 = math.log %28 : vector<1x2xf32>
    %30 = vector.broadcast %29 : vector<1x2xf32> to vector<8x2xf32>
    %31 = arith.subf %25, %30 : vector<8x2xf32>
    %c0_19 = arith.constant 0 : index
    %c0_20 = arith.constant 0 : index
    %32 = vector.load %arg8[%c0_19, %c0_20] : memref<8x2xf32, #tpu.memory_space<vmem>>, vector<8x2xf32>
    tpu.vector_store %arg8[%c0_19, %c0_20], %31 {strides = array<i32>} : memref<8x2xf32, #tpu.memory_space<vmem>>, vector<8x2xf32>,
    return
  }
  func.func @transform_0(%arg0: i32) -> (i32, i32) {
    %c0_i32 = arith.constant 0 : i32
    %c0_i32_0 = arith.constant 0 : i32
    return %arg0, %c0_i32 : i32, i32
  }
  func.func @transform_1(%arg0: i32) -> (i32, i32) {
    %c0_i32 = arith.constant 0 : i32
    %c0_i32_0 = arith.constant 0 : i32
    %c0_i32_1 = arith.constant 0 : i32
    return %c0_i32, %c0_i32_0 : i32, i32
  }
  func.func @transform_2(%arg0: i32) -> (i32, i32) {
    %c0_i32 = arith.constant 0 : i32
    %c0_i32_0 = arith.constant 0 : i32
    %c0_i32_1 = arith.constant 0 : i32
    return %c0_i32, %c0_i32_0 : i32, i32
  }
  func.func @transform_3(%arg0: i32) -> (i32, i32) {
    %c0_i32 = arith.constant 0 : i32
    %c0_i32_0 = arith.constant 0 : i32
    %c0_i32_1 = arith.constant 0 : i32
    return %c0_i32, %c0_i32_0 : i32, i32
  }
  func.func @transform_4(%arg0: i32) -> (i32, i32) {
    %c0_i32 = arith.constant 0 : i32
    %c0_i32_0 = arith.constant 0 : i32
    %c0_i32_1 = arith.constant 0 : i32
    return %c0_i32, %c0_i32_0 : i32, i32
  }
  func.func @transform_5(%arg0: i32) -> (i32, i32) {
    %c0_i32 = arith.constant 0 : i32
    %c0_i32_0 = arith.constant 0 : i32
    %c0_i32_1 = arith.constant 0 : i32
    return %c0_i32, %c0_i32_0 : i32, i32
  }
  func.func @transform_6(%arg0: i32) -> (i32, i32) {
    %c0_i32 = arith.constant 0 : i32
    %c0_i32_0 = arith.constant 0 : i32
    %c0_i32_1 = arith.constant 0 : i32
    return %c0_i32, %c0_i32_0 : i32, i32
  }
  func.func @transform_7(%arg0: i32) -> (i32, i32) {
    %c0_i32 = arith.constant 0 : i32
    %c0_i32_0 = arith.constant 0 : i32
    return %c0_i32, %arg0 : i32, i32
  }
}

</mosaic_0001>

<bundles_post_ra>
// kernel: actor_forward.1
= control target key start
LH: loop header
LB: loop body
LE: loop exit
PB: predicated region body
PF: predicated region fallthrough
CT: control target
= control target key end

     0   :  { %vm104_vm0 = vcmask 130048   ;;  %v327_v1 = vmov 0   ;;  %vm199_vm1 = vcmask 523264   ;;  %vm238_vm2 = vcmask 261120   ;;  %s442_s0 = inlined_call_operand.vmem [shape: bf16[2,16], index: 0, kind: input, shape index: {}]   ;;  %s443_s2 = inlined_call_operand.vmem [shape: f32[64,1], index: 2, kind: input, shape index: {}]   ;;  %s444_s1 = inlined_call_operand.vmem [shape: bf16[64,16], index: 1, kind: input, shape index: {}]   ;;  %s445_s4 = inlined_call_operand.vmem [shape: f32[32,1], index: 4, kind: input, shape index: {}]   ;;  %s446_s6 = inlined_call_operand.vmem [shape: f32[8,1], index: 6, kind: input, shape index: {}]   ;;  %s447_s3 = inlined_call_operand.vmem [shape: bf16[32,64], index: 3, kind: input, shape index: {}]   ;;  %s448_s5 = inlined_call_operand.vmem [shape: bf16[8,32], index: 5, kind: input, shape index: {}]   ;;  %s449_s7 = inlined_call_operand.vmem [shape: f32[8,2], index: 7, kind: output, shape index: {}]  }
   0x1   :  { %v27_v0 = vld [vmem:[%s442_s0] sm:$0x1]  ;;  %320 = vset.pattern.permute.xlu0 %v327_v1  ;;  %v42_v2 = vld [vmem:[%s443_s2 + $0x30] sm:$0xff]  ;;  %321 = vset.pattern.permute.xlu1 %v327_v1  ;;  %v43_v8 = vld [vmem:[%s443_s2 + $0x38] sm:$0xff]  ;;  %vm255_vm3 = vcmask 15360  }
   0x2   :  { %v118_v3 = vsel %vm104_vm0, %v27_v0, 0  ;;  %76 = vperm.xlu0 %320, %v42_v2   ;;  %v40_v4 = vld [vmem:[%s443_s2 + $0x20] sm:$0xff]  ;;  %322 = vset.pattern.permute.xlu2 %v327_v1  ;;  %v38_v5 = vld [vmem:[%s443_s2 + $0x10] sm:$0xff]  ;;  %v41_v9 = vld [vmem:[%s443_s2 + $0x28] sm:$0xff] }
   0x3   :  { %318 = vmatpush.bf16.xpose.msra.mxu3 %v118_v3  ;;  %127 = vmatpush.bf16.xpose.msra.mxu0 %v118_v3  ;;  %v314_v6 = vld [vmem:[%s444_s1 + $0x10] sm:$0xff]  ;;  %v312_v7 = vld [vmem:[%s444_s1] sm:$0xff]  ;;  %v39_v10 = vld [vmem:[%s443_s2 + $0x18] sm:$0xff] }
   0x4   :  { %66 = vperm.xlu1 %321, %v40_v4   ;;  %56 = vperm.xlu2 %322, %v38_v5   ;;  %v36_v11 = vld [vmem:[%s443_s2] sm:$0xff]  ;;  %v37_v12 = vld [vmem:[%s443_s2 + $0x8] sm:$0xff]  ;;  %v167_v13 = vld [vmem:[%s445_s4 + $0x10] sm:$0xff] }
   0x5   :  { %v315_v14 = vld [vmem:[%s444_s1 + $0x18] sm:$0xff]  ;;  %v313_v15 = vld [vmem:[%s444_s1 + $0x8] sm:$0xff]  ;;  %v165_v17 = vld [vmem:[%s445_s4] sm:$0xff] }
   0x6   :  { %v168_v16 = vld [vmem:[%s445_s4 + $0x18] sm:$0xff]  ;;  %v166_v18 = vld [vmem:[%s445_s4 + $0x8] sm:$0xff]  ;;  %v232_v19 = vld [vmem:[%s446_s6] sm:$0xff] }
   0x7   :  { %v316_v56 = vld [vmem:[%s447_s3] sm:$0xff]  ;;  %v317_v57 = vld [vmem:[%s447_s3 + $0x8] sm:$0xff] }
   0xa   :  { %299 = vmatmul.msk.bf16.vlgmr.msra.gmra.mxu3 %vm104_vm0, %v314_v6  ;;  %297 = vmatmul.msk.bf16.vlgmr.msra.gmra.mxu0 %vm104_vm0, %v312_v7 }
   0xb   :  { %81 = vperm.xlu0 %320, %v43_v8  }
   0xc   :  { %71 = vperm.xlu1 %321, %v41_v9   ;;  %61 = vperm.xlu2 %322, %v39_v10  }
  0x13   :  { %46 = vperm.xlu0 %320, %v36_v11  }
  0x14   :  { %51 = vperm.xlu1 %321, %v37_v12   ;;  %181 = vperm.xlu2 %322, %v167_v13   ;;  %v231_v12 = vld [vmem:[%s448_s5] sm:$0xf] }
  0x1a   :  { %300 = vmatmul.msk.bf16.gmra.mxu3 %vm104_vm0, %v315_v14  ;;  %298 = vmatmul.msk.bf16.gmra.mxu0 %vm104_vm0, %v313_v15 }
  0x1b   :  { %186 = vperm.xlu0 %320, %v168_v16  }
  0x1c   :  { %171 = vperm.xlu1 %321, %v165_v17   ;;  %176 = vperm.xlu2 %322, %v166_v18  }
  0x23   :  { %235 = vperm.xlu0 %320, %v232_v19  }
  0x5e   :  { %v57_v28 = vpop.permute.xlu2 %56 }
  0x66   :  { %v62_v39 = vpop.permute.xlu2 %61 }
  0x6e   :  { %v182_v60 = vpop.permute.xlu2 %181 }
  0x74   :  { %v77_v25 = vpop.permute.xlu0 %76 }
  0x76   :  { %v67_v24 = vpop.permute.xlu1 %66  ;;  %v177_v62 = vpop.permute.xlu2 %176 }
  0x7d   :  { %v82_v30 = vpop.permute.xlu0 %81 }
  0x7e   :  { %v72_v29 = vpop.permute.xlu1 %71 }
  0x85   :  { %v47_v45 = vpop.permute.xlu0 %46 }
  0x86   :  { %v52_v44 = vpop.permute.xlu1 %51 }
  0x87   :  { %v129_v20 = vpop.f32.mrf.mxu0 }
  0x88   :  { %v130_v47 = vadd.f32 %v129_v20, %v47_v45 }
  0x8a   :  { %v149_v52 = vmax.f32 %v130_v47, 0.0 }
  0x8d   :  { %v139_v21 = vpop.f32.mrf.mxu3  ;;  %v187_v0 = vpop.permute.xlu0 %186 }
  0x8e   :  { %v140_v36 = vadd.f32 %v139_v21, %v67_v24  ;;  %v172_v4 = vpop.permute.xlu1 %171 }
  0x8f   :  { %v131_v22 = vpop.f32.mrf.mxu0 }
  0x90   :  { %v153_v46 = vmax.f32 %v140_v36, 0.0  ;;  %v132_v48 = vadd.f32 %v131_v22, %v52_v44 }
  0x92   :  { %v150_v53 = vmax.f32 %v132_v48, 0.0 }
  0x94   :  { %v157_v55 = vpack.c.bf16 %v150_v53, %v149_v52 }
  0x95   :  { %v141_v23 = vpop.f32.mrf.mxu3  ;;  %v236_v13 = vpop.permute.xlu0 %235 }
  0x96   :  { %v142_v33 = vadd.f32 %v141_v23, %v72_v29 }
  0x97   :  { %v134_v26 = vpop.f32.mrf.mxu0 }
  0x98   :  { %v154_v40 = vmax.f32 %v142_v33, 0.0  ;;  %v135_v41 = vadd.f32 %v134_v26, %v57_v28 }
  0x9a   :  { %v151_v49 = vmax.f32 %v135_v41, 0.0  ;;  %v159_v51 = vpack.c.bf16 %v154_v40, %v153_v46 }
  0x9d   :  { %v144_v27 = vpop.f32.mrf.mxu3 }
  0x9e   :  { %v145_v31 = vadd.f32 %v144_v27, %v77_v25 }
  0x9f   :  { %v136_v35 = vpop.f32.mrf.mxu0 }
  0xa0   :  { %v155_v37 = vmax.f32 %v145_v31, 0.0  ;;  %v137_v42 = vadd.f32 %v136_v35, %v62_v39 }
  0xa2   :  { %v152_v50 = vmax.f32 %v137_v42, 0.0 }
  0xa4   :  { %v158_v54 = vpack.c.bf16 %v152_v50, %v151_v49 }
  0xa5   :  { %v146_v32 = vpop.f32.mrf.mxu3 }
  0xa6   :  { %v147_v34 = vadd.f32 %v146_v32, %v82_v30 }
  0xa8   :  { %v156_v38 = vmax.f32 %v147_v34, 0.0 }
  0xaa   :  { %v160_v43 = vpack.c.bf16 %v156_v38, %v155_v37 }
  0xac   :  { %210 = vmatpush.bf16.msra.mxu1 %v160_v43 }
  0xb0   :  { %211 = vmatpush.bf16.msra.mxu1 %v159_v51 }
  0xb4   :  { %212 = vmatpush.bf16.msra.mxu1 %v158_v54 }
  0xb8   :  { %213 = vmatpush.bf16.msra.mxu1 %v157_v55 }
  0xbb   :  { %309 = vmatmul.msk.bf16.vlgmr.msra.gmra.mxu1 %vm199_vm1, %v316_v56 }
  0xcb   :  { %310 = vmatmul.msk.bf16.gmra.mxu1 %vm199_vm1, %v317_v57 }
 0x138   :  { %v215_v58 = vpop.f32.mrf.mxu1 }
 0x139   :  { %v216_v5 = vadd.f32 %v215_v58, %v172_v4 }
 0x13b   :  { %v225_v10 = vmax.f32 %v216_v5, 0.0 }
 0x140   :  { %v217_v59 = vpop.f32.mrf.mxu1 }
 0x141   :  { %v218_v2 = vadd.f32 %v217_v59, %v177_v62 }
 0x143   :  { %v226_v8 = vmax.f32 %v218_v2, 0.0 }
 0x145   :  { %v229_v11 = vpack.c.bf16 %v226_v8, %v225_v10 }
 0x148   :  { %v220_v61 = vpop.f32.mrf.mxu1 }
 0x149   :  { %v221_v63 = vadd.f32 %v220_v61, %v182_v60 }
 0x14b   :  { %v227_v6 = vmax.f32 %v221_v63, 0.0 }
 0x150   :  { %v222_v1 = vpop.f32.mrf.mxu1 }
 0x151   :  { %v223_v3 = vadd.f32 %v222_v1, %v187_v0 }
 0x153   :  { %v228_v7 = vmax.f32 %v223_v3, 0.0 }
 0x155   :  { %v230_v9 = vpack.c.bf16 %v228_v7, %v227_v6 }
 0x157   :  { %248 = vmatpush.bf16.msra.mxu2 %v230_v9 }
 0x15b   :  { %249 = vmatpush.bf16.msra.mxu2 %v229_v11 }
 0x15e   :  { %311 = vmatmul.msk.bf16.vlgmr.msra.gmra.mxu2 %vm238_vm2, %v231_v12 }
 0x1e1   :  { %v251_v14 = vpop.f32.mrf.mxu2 }
 0x1e2   :  { %v252_v15 = vadd.f32 %v251_v14, %v236_v13 }
 0x1e4   :  { %v256_v16 = vsel %vm255_vm3, %v252_v15, -inf }
 0x1e5   :  { %v257_v17 = vrot.slane %v256_v16, 4 }
 0x1e7   :  { %v258_v18 = vmax.f32 %v256_v16, %v257_v17 }
 0x1e9   :  { %v259_v19 = vrot.slane %v258_v18, 2  ;;  %v253_v20 = vpop.f32.mrf.mxu2 }
 0x1eb   :  { %v260_v21 = vmax.f32 %v258_v18, %v259_v19 }
 0x1ed   :  { %v261_v22 = vrot.slane %v260_v21, 1 }
 0x1ef   :  { %v262_v23 = vmax.f32 %v260_v21, %v261_v22 }
 0x1f1   :  { %v263_v24 = vsub.f32 %v252_v15, %v262_v23 }
 0x1f3   :  { %v264_v25 = vmul.f32 1.442695, %v263_v24 }
 0x1f5   :  { %323 = vpow2.f32 %v264_v25 }
 0x1fb   :  { %v324_v26 = vpop.eup %323 }
 0x1fc   :  { %v266_v27 = vsel %vm255_vm3, %v324_v26, 0.0 }
 0x1fd   :  { %v267_v28 = vrot.slane %v266_v27, 4 }
 0x1ff   :  { %v268_v29 = vadd.f32 %v267_v28, %v266_v27 }
 0x201   :  { %v269_v30 = vrot.slane %v268_v29, 2 }
 0x203   :  { %v270_v31 = vadd.f32 %v269_v30, %v268_v29 }
 0x205   :  { %v271_v32 = vrot.slane %v270_v31, 1 }
 0x207   :  { %v272_v33 = vadd.f32 %v271_v32, %v270_v31 }
 0x209   :  { %325 = vlog2.f32 %v272_v33 }
 0x20f   :  { %v326_v34 = vpop.eup %325 }
 0x210   :  { %v274_v35 = vmul.f32 0.6931472, %v326_v34 }
 0x212   :  { %v275_v36 = vsub.f32 %v263_v24, %v274_v35 }
 0x214   :  { %276 = vst.msk [vmem:[%s449_s7] sm:$0xff] %vm255_vm3, %v275_v36 }

</bundles_post_ra>
